<compile_context>
chip_gen: v6e
topology: v6e:2x2x1
jax: 0.10.0
libtpu: 0.0.40
codegen_flags: <defaults>
</compile_context>

<pallas_src>
from functools import partial

import jax
import jax.numpy as jnp
from jax.experimental import pallas as pl
from jax.experimental.pallas import tpu as pltpu


def _patch_embed_kernel(x_ref, w_ref, pos_ref, o_ref):
    # x_ref:   (tm, P) bf16 patch rows (row 0 of the full array is an all-zero
    #          row standing in for the cls token).
    # w_ref:   (P, E)  bf16 projection weight, rows permuted to (c, s1, s2).
    # pos_ref: (tm, E) f32  positional rows (cls + pos[0] in row 0, linear bias
    #          folded into the patch rows).
    # o_ref:   (tm, E) f32  final embedding rows (dense, row-0-aligned stores).
    o_ref[...] = (
        jnp.dot(x_ref[...], w_ref[...], preferred_element_type=jnp.float32)
        + pos_ref[...]
    )


def _pick_row_tile(rows, p_dim, e_dim, vmem_budget_bytes=12 * 1024 * 1024):
    # Per-step VMEM (double-buffered): bf16 x tile + f32 out tile + f32 pos tile.
    def fits(tm):
        per_step = tm * p_dim * 2 + tm * e_dim * 4 + tm * e_dim * 4
        return 2 * per_step <= vmem_budget_bytes

    for tm in (512, 256, 128):
        if rows % tm == 0 and fits(tm):
            return tm
    return rows  # full extent (always a legal block shape; small for real ViTs)


@partial(jax.jit, static_argnames=("patch_size",))
def patch_embedding(x, w, b, cls_token, positions, patch_size):
    """x: (B, C, H, W) f32; w: (P, E) (= nn.Linear(P, E).weight.T).

    Returns (B, N + 1, E) f32, matching the PyTorch module's forward.
    """
    B, C, H, W = x.shape
    p = patch_size
    h, wn = H // p, W // p
    N = h * wn
    P = p * p * C
    E = w.shape[-1]
    assert w.shape == (P, E), "w must be the (P, E) transpose of nn.Linear's (E, P) weight"
    R = N + 1  # cls row + N patch rows

    # Patch rearrange with channel-OUTERMOST feature order '(c s1 s2)' so the
    # gather / fused input DMA moves patch_size-long contiguous runs.  Cast to
    # bf16 first so the rearranged intermediate is half-width.
    xb = x.astype(jnp.bfloat16)
    xp = xb.reshape(B, C, h, p, wn, p)
    xp = jnp.transpose(xp, (0, 2, 4, 1, 3, 5)).reshape(B, N, P)
    # Prepend one zero row per batch: zero @ W == 0, so the kernel's row 0
    # becomes cls_token + positions[0] via the augmented positional table and
    # the kernel emits the full (B, N+1, E) directly (no concat epilogue).
    xp = jnp.pad(xp, ((0, 0), (1, 0), (0, 0)))

    # Permute weight rows from the module's '(s1 s2 c)' order to '(c s1 s2)';
    # bit-identical once paired with the xp layout above.
    wb = w.reshape(p, p, C, E).transpose(2, 0, 1, 3).reshape(P, E)
    wb = wb.astype(jnp.bfloat16)

    # Augmented positional rows: row 0 = cls + positions[0] (no linear bias),
    # rows 1..N = positions[1:] + linear bias.
    pos_aug = jnp.concatenate(
        [cls_token.reshape(1, E) + positions[:1], positions[1:] + b[None, :]],
        axis=0,
    ).astype(jnp.float32)

    tm = _pick_row_tile(R, P, E)
    # Row tiles OUTER, batch INNER: the pos block index depends only on the
    # outer axis, so the pos tile is fetched once per row tile and stays
    # resident across all B inner steps; the weight block index is constant so
    # it is fetched exactly once.
    grid = (R // tm, B)

    cost = pl.CostEstimate(
        flops=2 * B * R * P * E,
        transcendentals=0,
        bytes_accessed=B * R * P * 2 + P * E * 2 + R * E * 4 + B * R * E * 4,
    )

    return pl.pallas_call(
        _patch_embed_kernel,
        out_shape=jax.ShapeDtypeStruct((B, R, E), jnp.float32),
        grid_spec=pltpu.PrefetchScalarGridSpec(
            num_scalar_prefetch=0,
            grid=grid,
            in_specs=[
                pl.BlockSpec((None, tm, P), lambda ni, bi: (bi, ni, 0)),
                pl.BlockSpec((P, E), lambda ni, bi: (0, 0)),
                pl.BlockSpec((tm, E), lambda ni, bi: (ni, 0)),
            ],
            out_specs=pl.BlockSpec((None, tm, E), lambda ni, bi: (bi, ni, 0)),
        ),
        compiler_params=pltpu.CompilerParams(
            dimension_semantics=("parallel", "parallel"),
            allow_input_fusion=[True, False, False],
        ),
        cost_estimate=cost,
    )(xp, wb, pos_aug)


if __name__ == "__main__":
    # Small shapes consistent with the module.
    B, C, IMG, PATCH, EMB = 2, 4, 16, 4, 32
    N = (IMG // PATCH) ** 2          # 16 patches
    P = PATCH * PATCH * C            # 64 patch dim

    key = jax.random.PRNGKey(0)
    kx, kw, kb, kc, kp = jax.random.split(key, 5)

    x = jax.random.normal(kx, (B, C, IMG, IMG), dtype=jnp.float32)
    # nn.Linear(P, EMB): torch stores weight as (EMB, P); we pass it transposed (P, EMB).
    w = jax.random.normal(kw, (P, EMB), dtype=jnp.float32) * 0.02
    b = jax.random.normal(kb, (EMB,), dtype=jnp.float32) * 0.02
    cls_token = jax.random.normal(kc, (1, 1, EMB), dtype=jnp.float32)
    positions = jax.random.normal(kp, (N + 1, EMB), dtype=jnp.float32)

    out = patch_embedding(x, w, b, cls_token, positions, PATCH)
    out = jax.block_until_ready(out)

    # Pure-JAX f32 reference with the module's original '(s1 s2 c)' layout and
    # un-permuted weight; kernel uses bf16 MXU inputs, so compare at a
    # bf16-appropriate tolerance.
    h = wn = IMG // PATCH
    xp_ref = x.reshape(B, C, h, PATCH, wn, PATCH)
    xp_ref = jnp.transpose(xp_ref, (0, 2, 4, 3, 5, 1)).reshape(B, N, P)
    ref_patches = xp_ref @ w + b
    ref = jnp.concatenate(
        [jnp.broadcast_to(cls_token, (B, 1, EMB)), ref_patches], axis=1)
    ref = ref + positions

    assert out.shape == (B, N + 1, EMB)
    assert jnp.allclose(out, ref, atol=3e-2, rtol=3e-2)
    print("KERNEL_OK")
</pallas_src>

<mosaic_0001>
module attributes {stable_mosaic.version = 11 : i64} {
  func.func @_patch_embed_kernel(%arg0: i32, %arg1: i32, %arg2: memref<1x17x64xbf16, #tpu.memory_space<vmem>>, %arg3: memref<64x32xbf16, #tpu.memory_space<vmem>>, %arg4: memref<17x32xf32, #tpu.memory_space<vmem>>, %arg5: memref<1x17x32xf32, #tpu.memory_space<vmem>>) attributes {dimension_semantics = [#tpu.dimension_semantics<parallel>, #tpu.dimension_semantics<parallel>], iteration_bounds = array<i64: 1, 2>, scalar_prefetch = 0 : i64, scratch_operands = 0 : i64, tpu.core_type = #tpu.core_type<tc>, window_params = [{transform_indices = @transform_0, window_bounds = array<i64: 1, 17, 64>}, {pipeline_mode = #tpu.pipeline_mode<synchronous>, transform_indices = @transform_1, window_bounds = array<i64: 64, 32>}, {transform_indices = @transform_2, window_bounds = array<i64: 17, 32>}, {transform_indices = @transform_3, window_bounds = array<i64: 1, 17, 32>}]} {
    %c0 = arith.constant 0 : index
    %c0_0 = arith.constant 0 : index
    %c0_1 = arith.constant 0 : index
    %0 = vector.load %arg2[%c0, %c0_0, %c0_1] : memref<1x17x64xbf16, #tpu.memory_space<vmem>>, vector<1x17x64xbf16>
    %1 = vector.shape_cast %0 : vector<1x17x64xbf16> to vector<17x64xbf16>
    %c0_2 = arith.constant 0 : index
    %c0_3 = arith.constant 0 : index
    %2 = vector.load %arg3[%c0_2, %c0_3] : memref<64x32xbf16, #tpu.memory_space<vmem>>, vector<64x32xbf16>
    %cst = arith.constant dense<0.000000e+00> : vector<17x32xf32>
    %3 = tpu.matmul %1, %2, %cst {dimension_numbers = #tpu.dot_dimension_numbers<[1], [0], [0], [1], [0, 0, 1, 1], [], []>} : vector<17x64xbf16>, vector<64x32xbf16>, vector<17x32xf32> -> vector<17x32xf32>
    %c0_4 = arith.constant 0 : index
    %c0_5 = arith.constant 0 : index
    %4 = vector.load %arg4[%c0_4, %c0_5] : memref<17x32xf32, #tpu.memory_space<vmem>>, vector<17x32xf32>
    %5 = arith.addf %3, %4 : vector<17x32xf32>
    %c0_6 = arith.constant 0 : index
    %c0_7 = arith.constant 0 : index
    %c0_8 = arith.constant 0 : index
    %6 = vector.load %arg5[%c0_6, %c0_7, %c0_8] : memref<1x17x32xf32, #tpu.memory_space<vmem>>, vector<1x17x32xf32>
    %7 = vector.shape_cast %6 : vector<1x17x32xf32> to vector<17x32xf32>
    %8 = vector.shape_cast %5 : vector<17x32xf32> to vector<1x17x32xf32>
    tpu.vector_store %arg5[%c0_6, %c0_7, %c0_8], %8 {strides = array<i32>} : memref<1x17x32xf32, #tpu.memory_space<vmem>>, vector<1x17x32xf32>,
    return
  }
  func.func @transform_0(%arg0: i32, %arg1: i32) -> (i32, i32, i32) {
    %c0_i32 = arith.constant 0 : i32
    %c0_i32_0 = arith.constant 0 : i32
    return %arg1, %arg0, %c0_i32 : i32, i32, i32
  }
  func.func @transform_1(%arg0: i32, %arg1: i32) -> (i32, i32) {
    %c0_i32 = arith.constant 0 : i32
    %c0_i32_0 = arith.constant 0 : i32
    %c0_i32_1 = arith.constant 0 : i32
    return %c0_i32, %c0_i32_0 : i32, i32
  }
  func.func @transform_2(%arg0: i32, %arg1: i32) -> (i32, i32) {
    %c0_i32 = arith.constant 0 : i32
    %c0_i32_0 = arith.constant 0 : i32
    return %arg0, %c0_i32 : i32, i32
  }
  func.func @transform_3(%arg0: i32, %arg1: i32) -> (i32, i32, i32) {
    %c0_i32 = arith.constant 0 : i32
    %c0_i32_0 = arith.constant 0 : i32
    return %arg1, %arg0, %c0_i32 : i32, i32, i32
  }
}

</mosaic_0001>

<bundles_post_ra>
// kernel: patch_embedding.2
= control target key start
LH: loop header
LB: loop body
LE: loop exit
PB: predicated region body
PF: predicated region fallthrough
CT: control target
= control target key end

     0   :  { %s656_s17 = smov 0   ;;  %s658_s18 = smov 0   ;;  %s718_s0 = inlined_call_operand.vmem [shape: bf16[64,32], index: 0, kind: input, shape index: {}]   ;;  %s719_s1 = inlined_call_operand.vmem [shape: f32[17,32], index: 1, kind: input, shape index: {}]   ;;  %s720_s2 = inlined_call_operand.vmem [shape: bf16[2,16,64], index: 2, kind: input, shape index: {}]   ;;  %s721_s3 = inlined_call_operand.<no memory space> [shape: bf16[], index: 3, kind: input, shape index: {}]   ;;  %s722_s4 = inlined_call_operand.vmem [shape: f32[2,17,32], index: 4, kind: output, shape index: {}]  }
   0x1   :  { %v9_v0 = vstv %s721_s3  ;;  %s660_s19 = smov 0  }
   0x2   :  { %v654_v1 = vunpack.i.l.bf16 %v9_v0 }
   0x3 LB: > { %s28_s3 = sadd.s32 1, %s619_s18  ;;  %p535_p0 = scmp.ge.s32.totalorder %s623_s19, 1  ;;  %s623_s19 = sphi %s660_s19, %s19_s19   ;;  %s619_s18 = sphi %s658_s18, %s724_s18   ;;  %s615_s17 = sphi %s656_s17, %s723_s17  }
   0x4   : > { %p29_p1 = scmp.ge.s32.totalorder %s28_s3, 2  ;;  %p182_p2 = scmp.lt.s32.totalorder %s623_s19, 3 }
   0x6   : > { %s726_s3 = smov (%p29_p1, %s28_s3), 0  ;;  %p183_p3 = pnand %p535_p0, %p182_p2 }
   0x8   : > { %186 = sbr.rel (%p183_p3) target bundleno = 240 (0xf0), region = 32 }
   0xd   : > { %v595_v2 = vld [vmem:[%s718_s0 + $0x18] sm:$0xff]   ;;  %p227_p4 = scmp.lt.s32.totalorder %s615_s17, 1  ;;  %v284_v3 = vlaneseq  ;;  %v596_v4 = vld [vmem:[%s718_s0 + $0x10] sm:$0xff]   ;;  %v597_v5 = vld [vmem:[%s718_s0 + $0x8] sm:$0xff]   ;;  %vm289_vm1 = vcmask 1046528   ;;  %v625_v19 = vmov 0.0  }
   0xe   : > { %557 = vmatprep.subr.bf16.mxu0 %v595_v2  ;;  %v598_v7 = vld [vmem:[%s718_s0] sm:$0xff]   ;;  %vm368_vm2 = vcmask 523264   ;;  %v335_v25 = vld [vmem:[%s719_s1 + $0x10] sm:$0x1]  ;;  %vm426_vm3 = vcmask 253952   ;;  %vm423_vm4 = vcmask 261120  }
   0xf   : > { %s728_s17 = smov (!%p227_p4, %s615_s17), 1  ;;  %558 = vmatpush3.bf16.msra.mxu0 %v595_v2  ;;  %v285_v6 = vand.u32 127, %v284_v3  ;;  %v333_v27 = vld [vmem:[%s719_s1] sm:$0xff]  ;;  %v334_v32 = vld [vmem:[%s719_s1 + $0x8] sm:$0xff] }
  0x10   : > { %559 = vmatprep.subr.bf16.mxu0 %v596_v4  ;;  %s536_s26 = sshll.u32 %s728_s17, 1  ;;  %s569_s8 = smul.u32 24, %s728_s17 }
  0x11   : > { %s233_s27 = sadd.s32 4294967295, %s536_s26  ;;  %vm287_vm0 = vcmp.lt.s32.totalorder %v285_v6, 64 }
  0x12   : > { %s537_s28 = sshll.u32 %s233_s27, 2  ;;  %s254_s13 = scalar_lea.vmem %s722_s4, %s569_s8 }
  0x13   : > { %560 = vmatpush3.bf16.msra.mxu0 %v596_v4  ;;  %s235_s5 = scalar_lea.vmem %s720_s2, %s537_s28 }
  0x14   : > { %561 = vmatprep.subr.bf16.mxu0 %v597_v5  ;;  %v539_v8 = vld [vmem:[%s235_s5 + $0x4] sm:$0xff]  }
  0x15   : > { %v282_v9 = vunpack.c.l.bf16 %v539_v8  ;;  %v298_v10 = vunpack.c.h.bf16 %v539_v8 }
  0x17   : > { %562 = vmatpush3.bf16.msra.mxu0 %v597_v5  ;;  %v288_v11 = vsel %vm287_vm0, %v282_v9, %v654_v1  ;;  %v304_v12 = vsel %vm287_vm0, %v298_v10, %v654_v1 }
  0x18   : > { %563 = vmatprep.subr.bf16.mxu0 %v598_v7  ;;  %v290_v13 = vsel %vm289_vm1, %v288_v11, %v654_v1  ;;  %v306_v14 = vsel %vm289_vm1, %v304_v12, %v288_v11  ;;  %v314_v15 = vsel %vm289_vm1, %v654_v1, %v304_v12 }
  0x19   : > { %v291_v16 = vrot.slane %v290_v13, 7  ;;  %v307_v17 = vrot.slane %v306_v14, 7  ;;  %v315_v18 = vrot.slane %v314_v15, 7 }
  0x1b   : > { %564 = vmatpush3.bf16.msra.mxu0 %v598_v7  ;;  %v292_v20 = vpack.c.bf16 %v625_v19, %v291_v16  ;;  %v309_v21 = vpack.c.bf16 %v625_v19, %v307_v17  ;;  %v317_v22 = vpack.c.bf16 %v625_v19, %v315_v18 }
  0x1d   : > { %295 = vst [vmem:[#allocation7] sm:$0xf] %v292_v20  ;;  %312 = vst [vmem:[#allocation7 + $0x4] sm:$0xf] %v309_v21 }
  0x1e   : > { %320 = vst [vmem:[#allocation7 + $0x8] sm:$0xf] %v317_v22 }
  0x24   : > { %v599_v23 = vld [vmem:[#allocation7] sm:$0xff]  }
  0x25   : > { %v600_v24 = vld [vmem:[#allocation7 + $0x8] ss:$0 sps:$4 sm:$0x11]   ;;  %565 = vmatprep.mubr.msk.bf16.mxu0 %vm368_vm2, %v599_v23 }
  0x26   : > { %566 = vmatmul.mubr.msk.bf16.vlgmr.msra.gmra.mxu0 %vm368_vm2, %v600_v24 }
  0xe6   : > { %v567_v26 = vpop.f32.mrf.mxu0 }
  0xe7   : > { %v418_v28 = vadd.f32 %v567_v26, %v335_v25 }
  0xe8   : > { %v409_v29 = vpop.f32.mrf.mxu0 }
  0xe9   : > { %427 = vst.msk [vmem:[%s254_s13 + $0x10] sm:$0x1] %vm426_vm3, %v418_v28  ;;  %v410_v30 = vadd.f32 %v409_v29, %v333_v27 }
  0xea   : > { %v568_v31 = vpop.f32.mrf.mxu0 }
  0xeb   : > { %424 = vst.msk [vmem:[%s254_s13] sm:$0xff] %vm423_vm4, %v410_v30 }
  0xec   : > { %v412_v33 = vpop.f32.mrf.mxu0 }
  0xed   : > { %v413_v34 = vadd.f32 %v412_v33, %v334_v32 }
  0xef   : > { %425 = vst.msk [vmem:[%s254_s13 + $0x8] sm:$0xff] %vm423_vm4, %v413_v34 }
  0xf0 PF: > { %s19_s19 = sadd.s32 1, %s623_s19   ;;  %s723_s17 = smov %s619_s18 }
  0xf1   : > { %p16_p5 = scmp.ge.s32.totalorder %s19_s19, 4   ;;  %s724_s18 = smov %s726_s3 }
  0xf3   :  { %18 = sbr.rel (!%p16_p5) target bundleno = 3 (0x3), region = 69 }

</bundles_post_ra>
